<compile_context>
chip_gen: v7x
topology: tpu7x:2x2x1
jax: 0.10.0
libtpu: 0.0.40
codegen_flags: <defaults>
</compile_context>

<pallas_src>
import functools

import jax
import jax.numpy as jnp
from jax.experimental import pallas as pl
from jax.experimental.pallas import tpu as pltpu  # noqa: F401  (tuning hooks)


# ----------------------------------------------------------------------------
# Fused kernel: bipartite GCN encoder + per-class bilinear decoder.
#   gene_out = ReLU( ReLU(A_gc   @ (ifeat @ W_c2g)) @ W_g )
#   cell_out = ReLU( ReLU(A_gc^T @ (ufeat @ W_g2c)) @ W_c )
#   scores[r, u, v] = gene_out[u] @ Q[r] @ cell_out[v]
# ----------------------------------------------------------------------------
def net_kernel(a_gc_ref, ufeat_ref, ifeat_ref,
               w_c2g_ref, w_g2c_ref, w_g_ref, w_c_ref, q_ref,
               gene_ref, cell_ref, scores_ref,
               *, num_classes, d_hidden):
    f32 = jnp.float32
    cdt = w_g_ref.dtype                    # MXU operand dtype (bfloat16)

    a_gc = a_gc_ref[...]                   # [S, C] f32 (tiny; f32 keeps the
                                           #  single XLU transpose below simple)

    # ---------------- encoder ----------------
    # cells -> genes
    msg_c = jnp.dot(ifeat_ref[...], w_c2g_ref[...],
                    preferred_element_type=f32)                        # [C, D]
    h_g = jnp.dot(a_gc.astype(cdt), msg_c.astype(cdt),
                  preferred_element_type=f32)                          # [S, D]
    h_g = jnp.maximum(h_g, 0.0)                                        # ReLU, f32 VPU
    gene = jnp.maximum(
        jnp.dot(h_g.astype(cdt), w_g_ref[...], preferred_element_type=f32), 0.0)
    gene_ref[...] = gene

    # genes -> cells: one explicit f32 transpose of A_gc (XLU slot has slack
    # here; at production scale precompute A_cg once in HBM instead).
    msg_g = jnp.dot(ufeat_ref[...], w_g2c_ref[...],
                    preferred_element_type=f32)                        # [S, D]
    a_cg = jnp.transpose(a_gc)                                         # [C, S]
    h_c = jnp.dot(a_cg.astype(cdt), msg_g.astype(cdt),
                  preferred_element_type=f32)                          # [C, D]
    h_c = jnp.maximum(h_c, 0.0)
    cell = jnp.maximum(
        jnp.dot(h_c.astype(cdt), w_c_ref[...], preferred_element_type=f32), 0.0)
    cell_ref[...] = cell

    # ---------------- decoder ----------------
    # One fat lane-concatenated matmul for all rating classes: [S, D] @ [D, R*D].
    gq = jnp.dot(gene.astype(cdt), q_ref[...], preferred_element_type=f32)
    # Single hoisted transpose of cell (f32 transpose, then cast); every
    # per-class matmul below is a standard-layout [S, D] @ [D, C] jnp.dot.
    cell_t = jnp.transpose(cell).astype(cdt)                           # [D, C]
    for r in range(num_classes):                                       # static unroll
        gq_r = gq[:, r * d_hidden:(r + 1) * d_hidden].astype(cdt)      # [S, D]
        scores_ref[r] = jnp.dot(gq_r, cell_t, preferred_element_type=f32)


# ----------------------------------------------------------------------------
# One-time parameter preparation (hoisted OUT of the per-call path).
# ----------------------------------------------------------------------------
def prepare_params(params, compute_dtype=jnp.bfloat16):
    """Cast weights to the MXU operand dtype and lane-concatenate q_basis.

    q_basis [R, D, D] -> q_flat [D, R*D] so the decoder's first stage is a
    single fat matmul.  Call once; cache the result across forward calls.
    """
    d_gcn = params["w_g"].shape[1]
    num_classes = params["q_basis"].shape[0]
    q_flat = jnp.transpose(params["q_basis"], (1, 0, 2)).reshape(
        d_gcn, num_classes * d_gcn)
    return {
        "w_c2g": params["w_c2g"].astype(compute_dtype),
        "w_g2c": params["w_g2c"].astype(compute_dtype),
        "w_g":   params["w_g"].astype(compute_dtype),
        "w_c":   params["w_c"].astype(compute_dtype),
        "q_flat": q_flat.astype(compute_dtype),
    }


# ----------------------------------------------------------------------------
# Per-call wrapper: only a_gc / ufeat / ifeat are touched here.
# ----------------------------------------------------------------------------
def net_forward(a_gc, ufeat, ifeat, prepared):
    """Full Net.forward: returns (pred_ratings, gene_out, cell_out)."""
    src_num, dst_num = a_gc.shape
    d_u = ufeat.shape[1]
    d_i = ifeat.shape[1]
    d_gcn = prepared["w_g"].shape[1]
    num_classes = prepared["q_flat"].shape[1] // d_gcn
    cdt = prepared["w_g"].dtype
    c_bytes = jnp.dtype(cdt).itemsize

    # Features in the MXU operand dtype; adjacency kept f32 (tiny, transposed
    # once in-kernel).  No zero-padding of any input.
    ufeat_c = ufeat.astype(cdt)
    ifeat_c = ifeat.astype(cdt)
    a_gc_f = a_gc.astype(jnp.float32)

    # Advisory cost estimate from the REAL (unpadded) dims.
    flops = 2 * (dst_num * d_i * d_gcn                         # ifeat @ W_c2g
                 + src_num * dst_num * d_gcn                   # A_gc @ msg_c
                 + src_num * d_gcn * d_gcn                     # h_g @ W_g
                 + src_num * d_u * d_gcn                       # ufeat @ W_g2c
                 + dst_num * src_num * d_gcn                   # A_gc^T @ msg_g
                 + dst_num * d_gcn * d_gcn                     # h_c @ W_c
                 + src_num * d_gcn * num_classes * d_gcn       # gene @ Q_all
                 + num_classes * src_num * d_gcn * dst_num)    # (gene Q) @ cell^T
    bytes_accessed = (
        a_gc.size * 4
        + (ufeat.size + ifeat.size) * c_bytes
        + sum(prepared[k].size for k in
              ("w_c2g", "w_g2c", "w_g", "w_c", "q_flat")) * c_bytes
        + (src_num * d_gcn + dst_num * d_gcn
           + num_classes * src_num * dst_num) * 4)

    gene_out, cell_out, scores = pl.pallas_call(
        functools.partial(net_kernel, num_classes=num_classes, d_hidden=d_gcn),
        out_shape=(
            jax.ShapeDtypeStruct((src_num, d_gcn), jnp.float32),              # gene_out
            jax.ShapeDtypeStruct((dst_num, d_gcn), jnp.float32),              # cell_out
            jax.ShapeDtypeStruct((num_classes, src_num, dst_num), jnp.float32),  # scores
        ),
        cost_estimate=pl.CostEstimate(flops=flops, transcendentals=0,
                                      bytes_accessed=bytes_accessed),
    )(a_gc_f, ufeat_c, ifeat_c,
      prepared["w_c2g"], prepared["w_g2c"], prepared["w_g"], prepared["w_c"],
      prepared["q_flat"])

    # dec_graph = complete bipartite graph, edges enumerated gene-major.
    # TODO(synk): if the real dec_graph holds a subset of edges / a different
    # enumeration order, gather the relevant (src, dst) pairs here instead.
    pred_ratings = jnp.transpose(scores, (1, 2, 0)).reshape(
        src_num * dst_num, num_classes)
    return pred_ratings, gene_out, cell_out


net_forward_jit = jax.jit(net_forward)


# ----------------------------------------------------------------------------
# Main: deterministic params + inputs, run once, verify it executes.
# ----------------------------------------------------------------------------
if __name__ == "__main__":
    src_num = 16        # number of genes (src nodes)
    dst_num = 24        # number of cells (dst nodes)
    d_ufeat = 32        # raw gene feature dim
    d_ifeat = 32        # raw cell feature dim
    d_gcn = 32          # hidden / output embedding dim
    class_item = 4      # number of rating classes

    key = jax.random.PRNGKey(0)
    keys = jax.random.split(key, 8)

    # raw node features
    ufeat = jax.random.normal(keys[0], (src_num, d_ufeat), dtype=jnp.float32)
    ifeat = jax.random.normal(keys[1], (dst_num, d_ifeat), dtype=jnp.float32)

    # enc_graph: random bipartite adjacency, symmetrically normalized (plain JAX glue)
    # TODO(synk): verify this matches the DGL GraphConv norm mode of DGLLayer.
    adj = (jax.random.uniform(keys[2], (src_num, dst_num)) < 0.3).astype(jnp.float32)
    deg_g = jnp.sum(adj, axis=1, keepdims=True) + 1.0
    deg_c = jnp.sum(adj, axis=0, keepdims=True) + 1.0
    a_gc = adj / jnp.sqrt(deg_g) / jnp.sqrt(deg_c)   # [src_num, dst_num]

    # deterministic parameter init (Glorot-ish scaling)
    def init(k, shape):
        fan = shape[-2] + shape[-1]
        return jax.random.normal(k, shape, dtype=jnp.float32) * jnp.sqrt(2.0 / fan)

    params = {
        "w_c2g": init(keys[3], (d_ifeat, d_gcn)),    # cell -> gene message proj
        "w_g2c": init(keys[4], (d_ufeat, d_gcn)),    # gene -> cell message proj
        "w_g":   init(keys[5], (d_gcn, d_gcn)),      # gene dense out
        "w_c":   init(keys[6], (d_gcn, d_gcn)),      # cell dense out
        "q_basis": init(keys[7], (class_item, d_gcn, d_gcn)),  # decoder basis
    }

    # One-time parameter prep (cached across calls); only features per call.
    prepared = prepare_params(params)
    prepared = jax.tree_util.tree_map(jax.block_until_ready, prepared)

    pred_ratings, gene_out, cell_out = net_forward_jit(a_gc, ufeat, ifeat, prepared)
    jax.block_until_ready((pred_ratings, gene_out, cell_out))

    assert pred_ratings.shape == (src_num * dst_num, class_item)
    assert gene_out.shape == (src_num, d_gcn)
    assert cell_out.shape == (dst_num, d_gcn)
    print("KERNEL_OK")
</pallas_src>

<mosaic_0001>
module attributes {stable_mosaic.version = 11 : i64} {
  func.func @net_kernel(%arg0: memref<16x24xf32, #tpu.memory_space<vmem>>, %arg1: memref<16x32xbf16, #tpu.memory_space<vmem>>, %arg2: memref<24x32xbf16, #tpu.memory_space<vmem>>, %arg3: memref<32x32xbf16, #tpu.memory_space<vmem>>, %arg4: memref<32x32xbf16, #tpu.memory_space<vmem>>, %arg5: memref<32x32xbf16, #tpu.memory_space<vmem>>, %arg6: memref<32x32xbf16, #tpu.memory_space<vmem>>, %arg7: memref<32x128xbf16, #tpu.memory_space<vmem>>, %arg8: memref<16x32xf32, #tpu.memory_space<vmem>>, %arg9: memref<24x32xf32, #tpu.memory_space<vmem>>, %arg10: memref<4x16x24xf32, #tpu.memory_space<vmem>>) attributes {dimension_semantics = [], scalar_prefetch = 0 : i64, scratch_operands = 0 : i64, tpu.core_type = #tpu.core_type<tc>} {
    %c0 = arith.constant 0 : index
    %c0_0 = arith.constant 0 : index
    %0 = vector.load %arg0[%c0, %c0_0] : memref<16x24xf32, #tpu.memory_space<vmem>>, vector<16x24xf32>
    %c0_1 = arith.constant 0 : index
    %c0_2 = arith.constant 0 : index
    %1 = vector.load %arg2[%c0_1, %c0_2] : memref<24x32xbf16, #tpu.memory_space<vmem>>, vector<24x32xbf16>
    %c0_3 = arith.constant 0 : index
    %c0_4 = arith.constant 0 : index
    %2 = vector.load %arg3[%c0_3, %c0_4] : memref<32x32xbf16, #tpu.memory_space<vmem>>, vector<32x32xbf16>
    %cst = arith.constant dense<0.000000e+00> : vector<24x32xf32>
    %3 = tpu.matmul %1, %2, %cst {dimension_numbers = #tpu.dot_dimension_numbers<[1], [0], [0], [1], [0, 0, 1, 1], [], []>} : vector<24x32xbf16>, vector<32x32xbf16>, vector<24x32xf32> -> vector<24x32xf32>
    %4 = arith.truncf %0 : vector<16x24xf32> to vector<16x24xbf16>
    %5 = arith.truncf %3 : vector<24x32xf32> to vector<24x32xbf16>
    %cst_5 = arith.constant dense<0.000000e+00> : vector<16x32xf32>
    %6 = tpu.matmul %4, %5, %cst_5 {dimension_numbers = #tpu.dot_dimension_numbers<[1], [0], [0], [1], [0, 0, 1, 1], [], []>} : vector<16x24xbf16>, vector<24x32xbf16>, vector<16x32xf32> -> vector<16x32xf32>
    %cst_6 = arith.constant 0.000000e+00 : f32
    %7 = vector.broadcast %cst_6 : f32 to vector<16x32xf32>
    %8 = arith.maximumf %6, %7 : vector<16x32xf32>
    %9 = arith.truncf %8 : vector<16x32xf32> to vector<16x32xbf16>
    %c0_7 = arith.constant 0 : index
    %c0_8 = arith.constant 0 : index
    %10 = vector.load %arg5[%c0_7, %c0_8] : memref<32x32xbf16, #tpu.memory_space<vmem>>, vector<32x32xbf16>
    %cst_9 = arith.constant dense<0.000000e+00> : vector<16x32xf32>
    %11 = tpu.matmul %9, %10, %cst_9 {dimension_numbers = #tpu.dot_dimension_numbers<[1], [0], [0], [1], [0, 0, 1, 1], [], []>} : vector<16x32xbf16>, vector<32x32xbf16>, vector<16x32xf32> -> vector<16x32xf32>
    %cst_10 = arith.constant 0.000000e+00 : f32
    %12 = vector.broadcast %cst_10 : f32 to vector<16x32xf32>
    %13 = arith.maximumf %11, %12 : vector<16x32xf32>
    %c0_11 = arith.constant 0 : index
    %c0_12 = arith.constant 0 : index
    %14 = vector.load %arg8[%c0_11, %c0_12] : memref<16x32xf32, #tpu.memory_space<vmem>>, vector<16x32xf32>
    tpu.vector_store %arg8[%c0_11, %c0_12], %13 {strides = array<i32>} : memref<16x32xf32, #tpu.memory_space<vmem>>, vector<16x32xf32>,
    %c0_13 = arith.constant 0 : index
    %c0_14 = arith.constant 0 : index
    %15 = vector.load %arg1[%c0_13, %c0_14] : memref<16x32xbf16, #tpu.memory_space<vmem>>, vector<16x32xbf16>
    %c0_15 = arith.constant 0 : index
    %c0_16 = arith.constant 0 : index
    %16 = vector.load %arg4[%c0_15, %c0_16] : memref<32x32xbf16, #tpu.memory_space<vmem>>, vector<32x32xbf16>
    %cst_17 = arith.constant dense<0.000000e+00> : vector<16x32xf32>
    %17 = tpu.matmul %15, %16, %cst_17 {dimension_numbers = #tpu.dot_dimension_numbers<[1], [0], [0], [1], [0, 0, 1, 1], [], []>} : vector<16x32xbf16>, vector<32x32xbf16>, vector<16x32xf32> -> vector<16x32xf32>
    %18 = tpu.transpose %0, [1, 0] : vector<16x24xf32> -> vector<24x16xf32>
    %19 = arith.truncf %18 : vector<24x16xf32> to vector<24x16xbf16>
    %20 = arith.truncf %17 : vector<16x32xf32> to vector<16x32xbf16>
    %cst_18 = arith.constant dense<0.000000e+00> : vector<24x32xf32>
    %21 = tpu.matmul %19, %20, %cst_18 {dimension_numbers = #tpu.dot_dimension_numbers<[1], [0], [0], [1], [0, 0, 1, 1], [], []>} : vector<24x16xbf16>, vector<16x32xbf16>, vector<24x32xf32> -> vector<24x32xf32>
    %cst_19 = arith.constant 0.000000e+00 : f32
    %22 = vector.broadcast %cst_19 : f32 to vector<24x32xf32>
    %23 = arith.maximumf %21, %22 : vector<24x32xf32>
    %24 = arith.truncf %23 : vector<24x32xf32> to vector<24x32xbf16>
    %c0_20 = arith.constant 0 : index
    %c0_21 = arith.constant 0 : index
    %25 = vector.load %arg6[%c0_20, %c0_21] : memref<32x32xbf16, #tpu.memory_space<vmem>>, vector<32x32xbf16>
    %cst_22 = arith.constant dense<0.000000e+00> : vector<24x32xf32>
    %26 = tpu.matmul %24, %25, %cst_22 {dimension_numbers = #tpu.dot_dimension_numbers<[1], [0], [0], [1], [0, 0, 1, 1], [], []>} : vector<24x32xbf16>, vector<32x32xbf16>, vector<24x32xf32> -> vector<24x32xf32>
    %cst_23 = arith.constant 0.000000e+00 : f32
    %27 = vector.broadcast %cst_23 : f32 to vector<24x32xf32>
    %28 = arith.maximumf %26, %27 : vector<24x32xf32>
    %c0_24 = arith.constant 0 : index
    %c0_25 = arith.constant 0 : index
    %29 = vector.load %arg9[%c0_24, %c0_25] : memref<24x32xf32, #tpu.memory_space<vmem>>, vector<24x32xf32>
    tpu.vector_store %arg9[%c0_24, %c0_25], %28 {strides = array<i32>} : memref<24x32xf32, #tpu.memory_space<vmem>>, vector<24x32xf32>,
    %30 = arith.truncf %13 : vector<16x32xf32> to vector<16x32xbf16>
    %c0_26 = arith.constant 0 : index
    %c0_27 = arith.constant 0 : index
    %31 = vector.load %arg7[%c0_26, %c0_27] : memref<32x128xbf16, #tpu.memory_space<vmem>>, vector<32x128xbf16>
    %cst_28 = arith.constant dense<0.000000e+00> : vector<16x128xf32>
    %32 = tpu.matmul %30, %31, %cst_28 {dimension_numbers = #tpu.dot_dimension_numbers<[1], [0], [0], [1], [0, 0, 1, 1], [], []>} : vector<16x32xbf16>, vector<32x128xbf16>, vector<16x128xf32> -> vector<16x128xf32>
    %33 = tpu.transpose %28, [1, 0] : vector<24x32xf32> -> vector<32x24xf32>
    %34 = arith.truncf %33 : vector<32x24xf32> to vector<32x24xbf16>
    %35 = vector.extract_strided_slice %32 {offsets = [0, 0], sizes = [16, 32], strides = [1, 1]} : vector<16x128xf32> to vector<16x32xf32>
    %36 = arith.truncf %35 : vector<16x32xf32> to vector<16x32xbf16>
    %cst_29 = arith.constant dense<0.000000e+00> : vector<16x24xf32>
    %37 = tpu.matmul %36, %34, %cst_29 {dimension_numbers = #tpu.dot_dimension_numbers<[1], [0], [0], [1], [0, 0, 1, 1], [], []>} : vector<16x32xbf16>, vector<32x24xbf16>, vector<16x24xf32> -> vector<16x24xf32>
    %c0_30 = arith.constant 0 : index
    %c0_31 = arith.constant 0 : index
    %c0_32 = arith.constant 0 : index
    %38 = vector.load %arg10[%c0_30, %c0_31, %c0_32] : memref<4x16x24xf32, #tpu.memory_space<vmem>>, vector<1x16x24xf32>
    %39 = vector.shape_cast %38 : vector<1x16x24xf32> to vector<16x24xf32>
    %40 = vector.shape_cast %37 : vector<16x24xf32> to vector<1x16x24xf32>
    tpu.vector_store %arg10[%c0_30, %c0_31, %c0_32], %40 {strides = array<i32>} : memref<4x16x24xf32, #tpu.memory_space<vmem>>, vector<1x16x24xf32>,
    %41 = vector.extract_strided_slice %32 {offsets = [0, 32], sizes = [16, 32], strides = [1, 1]} : vector<16x128xf32> to vector<16x32xf32>
    %42 = arith.truncf %41 : vector<16x32xf32> to vector<16x32xbf16>
    %cst_33 = arith.constant dense<0.000000e+00> : vector<16x24xf32>
    %43 = tpu.matmul %42, %34, %cst_33 {dimension_numbers = #tpu.dot_dimension_numbers<[1], [0], [0], [1], [0, 0, 1, 1], [], []>} : vector<16x32xbf16>, vector<32x24xbf16>, vector<16x24xf32> -> vector<16x24xf32>
    %c1 = arith.constant 1 : index
    %c0_34 = arith.constant 0 : index
    %c0_35 = arith.constant 0 : index
    %44 = vector.load %arg10[%c1, %c0_34, %c0_35] : memref<4x16x24xf32, #tpu.memory_space<vmem>>, vector<1x16x24xf32>
    %45 = vector.shape_cast %44 : vector<1x16x24xf32> to vector<16x24xf32>
    %46 = vector.shape_cast %43 : vector<16x24xf32> to vector<1x16x24xf32>
    tpu.vector_store %arg10[%c1, %c0_34, %c0_35], %46 {strides = array<i32>} : memref<4x16x24xf32, #tpu.memory_space<vmem>>, vector<1x16x24xf32>,
    %47 = vector.extract_strided_slice %32 {offsets = [0, 64], sizes = [16, 32], strides = [1, 1]} : vector<16x128xf32> to vector<16x32xf32>
    %48 = arith.truncf %47 : vector<16x32xf32> to vector<16x32xbf16>
    %cst_36 = arith.constant dense<0.000000e+00> : vector<16x24xf32>
    %49 = tpu.matmul %48, %34, %cst_36 {dimension_numbers = #tpu.dot_dimension_numbers<[1], [0], [0], [1], [0, 0, 1, 1], [], []>} : vector<16x32xbf16>, vector<32x24xbf16>, vector<16x24xf32> -> vector<16x24xf32>
    %c2 = arith.constant 2 : index
    %c0_37 = arith.constant 0 : index
    %c0_38 = arith.constant 0 : index
    %50 = vector.load %arg10[%c2, %c0_37, %c0_38] : memref<4x16x24xf32, #tpu.memory_space<vmem>>, vector<1x16x24xf32>
    %51 = vector.shape_cast %50 : vector<1x16x24xf32> to vector<16x24xf32>
    %52 = vector.shape_cast %49 : vector<16x24xf32> to vector<1x16x24xf32>
    tpu.vector_store %arg10[%c2, %c0_37, %c0_38], %52 {strides = array<i32>} : memref<4x16x24xf32, #tpu.memory_space<vmem>>, vector<1x16x24xf32>,
    %53 = vector.extract_strided_slice %32 {offsets = [0, 96], sizes = [16, 32], strides = [1, 1]} : vector<16x128xf32> to vector<16x32xf32>
    %54 = arith.truncf %53 : vector<16x32xf32> to vector<16x32xbf16>
    %cst_39 = arith.constant dense<0.000000e+00> : vector<16x24xf32>
    %55 = tpu.matmul %54, %34, %cst_39 {dimension_numbers = #tpu.dot_dimension_numbers<[1], [0], [0], [1], [0, 0, 1, 1], [], []>} : vector<16x32xbf16>, vector<32x24xbf16>, vector<16x24xf32> -> vector<16x24xf32>
    %c3 = arith.constant 3 : index
    %c0_40 = arith.constant 0 : index
    %c0_41 = arith.constant 0 : index
    %56 = vector.load %arg10[%c3, %c0_40, %c0_41] : memref<4x16x24xf32, #tpu.memory_space<vmem>>, vector<1x16x24xf32>
    %57 = vector.shape_cast %56 : vector<1x16x24xf32> to vector<16x24xf32>
    %58 = vector.shape_cast %55 : vector<16x24xf32> to vector<1x16x24xf32>
    tpu.vector_store %arg10[%c3, %c0_40, %c0_41], %58 {strides = array<i32>} : memref<4x16x24xf32, #tpu.memory_space<vmem>>, vector<1x16x24xf32>,
    return
  }
}

</mosaic_0001>

<bundles_post_ra>
// kernel: net_forward.1
= control target key start
LH: loop header
LB: loop body
LE: loop exit
PB: predicated region body
PF: predicated region fallthrough
CT: control target
= control target key end

     0   :  { %16 = vsyncpa [#allocation3], 0  ;;  %s1403_s0 = inlined_call_operand.vmem [shape: f32[16,24], index: 0, kind: input, shape index: {}]   ;;  %s1404_s1 = inlined_call_operand.vmem [shape: bf16[16,32], index: 1, kind: input, shape index: {}]   ;;  %s1405_s2 = inlined_call_operand.vmem [shape: bf16[24,32], index: 2, kind: input, shape index: {}]   ;;  %s1406_s3 = inlined_call_operand.vmem [shape: bf16[32,32], index: 3, kind: input, shape index: {}]   ;;  %s1407_s4 = inlined_call_operand.vmem [shape: bf16[32,32], index: 4, kind: input, shape index: {}]   ;;  %s1408_s5 = inlined_call_operand.hbm [shape: bf16[32,32], index: 5, kind: input, shape index: {}]   ;;  %s1409_s6 = inlined_call_operand.hbm [shape: bf16[32,32], index: 6, kind: input, shape index: {}]   ;;  %s1410_s7 = inlined_call_operand.hbm [shape: bf16[32,128], index: 7, kind: input, shape index: {}]   ;;  %s1411_s8 = inlined_call_operand.hbm [shape: f32[16,32], index: 8, kind: output, shape index: {0}]   ;;  %s1412_s9 = inlined_call_operand.hbm [shape: f32[24,32], index: 9, kind: output, shape index: {1}]   ;;  %s1413_s10 = inlined_call_operand.vmem [shape: f32[4,16,24], index: 10, kind: output, shape index: {2}]  }
   0x1   :  { %17 = vsyncpa [#allocation6], 0 }
   0x2   :  { %18 = vsyncpa [#allocation4], 0 }
   0x3   :  { %19 = vsyncpa [#allocation10], 0  ;;  %s1143_s13 = smov [#allocation5]   ;;  %s1144_s15 = smov [#allocation2]  }
   0x4   :  { %s47_s14 = sshll.u32 %s1143_s13, 4  ;;  %s35_s16 = sshll.u32 %s1144_s15, 4  ;;  %s48_s14 = int_to_ptr.vmem [resolvable:$true] %s47_s14  ;;  %s1211_s16 = int_to_ptr.vmem [resolvable:$true] %s35_s16 }
   0x5   :  { %s1025_s19 = scalar_lea.hbm %s1409_s6, 256 }
   0x6   :  { %p1026_p0 = scmp.ne.s32.totalorder %s1409_s6, %s1025_s19  ;;  %p1029_p1 = scmp.lt.u32.totalorder %s1025_s19, %s1409_s6 }
   0x8   :  { %p1031_p2 = pnand %p1029_p1, %p1026_p0 }
   0xa   :  { %1034 = shalt.err (!%p1031_p2)
}
   0xb   :  { %s1035_s24 = scalar_lea.vmem %s48_s14, 256  ;;  %p1040_p4 = scmp.lt.s32.totalorder %s48_s14, %s48_s14 }
   0xc   :  { %p1036_p3 = scmp.ne.s32.totalorder %s48_s14, %s1035_s24  ;;  %p1041_p5 = scmp.lt.s32.totalorder %s1035_s24, %s1035_s24 }
   0xe   :  { %p1042_p6 = por %p1041_p5, %p1040_p4 }
  0x10   :  { %p1043_p7 = pnand %p1042_p6, %p1036_p3 }
  0x12   :  { %1046 = shalt.err (!%p1043_p7)
}
  0x13   :  { %s1145_s25 = smov 64   ;;  %s1146_s26 = smov 4  }
  0x14   :  { %53 = dma.hbm_to_vmem [thread:$0]  %s1409_s6, 256, %s48_s14, [#allocation6], %s1145_s25, %s1145_s25, %s1146_s26  }
  0x15   :  { %s1047_s11 = scalar_lea.hbm %s1408_s5, 256 }
  0x16   :  { %p1048_p8 = scmp.ne.s32.totalorder %s1408_s5, %s1047_s11  ;;  %p1051_p9 = scmp.lt.u32.totalorder %s1047_s11, %s1408_s5 }
  0x18   :  { %p1053_p10 = pnand %p1051_p9, %p1048_p8 }
  0x1a   :  { %1056 = shalt.err (!%p1053_p10)
}
  0x1b   :  { %s1057_s18 = scalar_lea.vmem %s1211_s16, 256  ;;  %p1062_p12 = scmp.lt.s32.totalorder %s1211_s16, %s1211_s16 }
  0x1c   :  { %p1058_p11 = scmp.ne.s32.totalorder %s1211_s16, %s1057_s18  ;;  %p1063_p13 = scmp.lt.s32.totalorder %s1057_s18, %s1057_s18 }
  0x1e   :  { %p1064_p0 = por %p1063_p13, %p1062_p12 }
  0x20   :  { %p1065_p1 = pnand %p1064_p0, %p1058_p11 }
  0x22   :  { %1068 = shalt.err (!%p1065_p1)
}
  0x23   :  { %41 = dma.hbm_to_vmem [thread:$0]  %s1408_s5, 256, %s1211_s16, [#allocation3], %s1145_s25, %s1145_s25, %s1146_s26  }
  0x24   :  { %s1147_s19 = smov [#allocation7]   ;;  %s1069_s23 = scalar_lea.hbm %s1410_s7, 256 }
  0x25   :  { %s59_s20 = sshll.u32 %s1147_s19, 4  ;;  %p1070_p2 = scmp.ne.s32.totalorder %s1410_s7, %s1069_s23  ;;  %s60_s20 = int_to_ptr.vmem [resolvable:$true] %s59_s20 }
  0x26   :  { %p1073_p3 = scmp.lt.u32.totalorder %s1069_s23, %s1410_s7 }
  0x28   :  { %p1075_p4 = pnand %p1073_p3, %p1070_p2 }
  0x2a   :  { %1078 = shalt.err (!%p1075_p4)
}
  0x2b   :  { %s1079_s30 = scalar_lea.vmem %s60_s20, 256  ;;  %p1084_p6 = scmp.lt.s32.totalorder %s60_s20, %s60_s20 }
  0x2c   :  { %p1080_p5 = scmp.ne.s32.totalorder %s60_s20, %s1079_s30  ;;  %p1085_p7 = scmp.lt.s32.totalorder %s1079_s30, %s1079_s30 }
  0x2e   :  { %p1086_p8 = por %p1085_p7, %p1084_p6 }
  0x30   :  { %p1087_p9 = pnand %p1086_p8, %p1080_p5 }
  0x32   :  { %1090 = shalt.err (!%p1087_p9)
}
  0x33   :  { %65 = dma.hbm_to_vmem [thread:$0]  %s1410_s7, 256, %s60_s20, [#allocation6], %s1145_s25, %s1145_s25, %s1146_s26  }
  0x34   :  { %1135 = dma.done.wait [#allocation3], 256  }
  0x35   :  { %1136 = vsyncadd [#allocation3], 4294967040 }
  0x36   :  { %1137 = dma.done.wait [#allocation6], 512  }
  0x37   :  { %1138 = vsyncadd [#allocation6], 4294966784  ;;  %v1012_v0 = vld [vmem:[%s1406_s3] sm:$0xff]   ;;  %v1013_v1 = vld [vmem:[%s1406_s3 + $0x8] sm:$0xff]   ;;  %vm105_vm0 = vcmask 261120   ;;  %v1148_v4 = vmov 0.0  }
  0x38   :  { %913 = vmatprep.subr.bf16.mxu0 %v1012_v0  ;;  %v1014_v2 = vld [vmem:[%s1405_s2] sm:$0xff]   ;;  %v1015_v3 = vld [vmem:[%s1405_s2 + $0x8] ss:$0 sps:$4 sm:$0xff]   ;;  %921 = vmatprep.subr.bf16.mxu1 %v1148_v4  ;;  %vm1149_vm1 = vmmov 0   ;;  %vm167_vm2 = vcmask 1043456   ;;  %vm163_vm3 = vcmask 195584  }
  0x39   :  { %914 = vmatpush3.bf16.msra.mxu0 %v1012_v0  ;;  %917 = vmatprep.mubr.msk.bf16.mxu0 %vm105_vm0, %v1014_v2  ;;  %v76_v5 = vld [vmem:[%s1403_s0] sm:$0xff]  ;;  %v77_v6 = vld [vmem:[%s1403_s0 + $0x8] sm:$0xff]  ;;  %vm381_vm4 = vcmask 130048   ;;  %v1023_v39 = vld [vmem:[#allocation5] sm:$0xff]   ;;  %s1153_s27 = smov [#allocation9]  }
  0x3a   :  { %915 = vmatprep.subr.bf16.mxu0 %v1013_v1  ;;  %925 = vmatprep.mubr.msk.bf16.mxu1 %vm1149_vm1, %v1148_v4  ;;  %v160_v7 = vpack.c.bf16 %v77_v6, %v76_v5  ;;  %v1016_v15 = vld [vmem:[%s1407_s4] sm:$0xff]   ;;  %v1017_v16 = vld [vmem:[%s1407_s4 + $0x8] sm:$0xff]   ;;  %v1024_v40 = vld [vmem:[#allocation5 + $0x8] sm:$0xff]   ;;  %s1151_s4 = smov 96   ;;  %s824_s28 = sshll.u32 %s1153_s27, 4  ;;  %s1340_s28 = int_to_ptr.vmem [resolvable:$true] %s824_s28 }
  0x3b   :  { %346 = vxpose.xlu0.b32.start [1/2] (short) (narrow) %v76_v5, 24  ;;  %v1018_v17 = vld [vmem:[%s1404_s1] sm:$0xff]   ;;  %v1020_v19 = vld [vmem:[#allocation2 + $0x8] sm:$0xff]   ;;  %s1150_s1 = smov 32  }
  0x3c   :  { %v1019_v18 = vld [vmem:[#allocation2] sm:$0xff]   ;;  %v1022_v38 = vld [vmem:[#allocation7 + $0x8] sm:$0xff]  }
  0x3d   :  { %916 = vmatpush3.bf16.msra.mxu0 %v1013_v1  ;;  %v1021_v37 = vld [vmem:[#allocation7] sm:$0xff]  }
  0x3e   :  { %929 = vmatprep.subr.bf16.mxu0 %v1148_v4 }
  0x3f   :  { %347 = vxpose.xlu0.b32.end [2/2] (short) (narrow) %v77_v6, 24 }
  0x40   :  { %918 = vmatmul.mubr.msk.bf16.vlgmr.msra.gmra.mrb[0].mxu0 %vm105_vm0, %v1015_v3 }
  0x41   :  { %933 = vmatprep.mubr.msk.bf16.mxu0 %vm1149_vm1, %v1148_v4  ;;  %930 = vmatpush3.bf16.msra.mxu0 %v1019_v18 }
  0x42   :  { %931 = vmatprep.subr.bf16.mxu0 %v1148_v4 }
  0x45   :  { %932 = vmatpush3.bf16.msra.mxu0 %v1020_v19 }
  0xbb   :  { %v362_v20 = vpop.trf.xlu0 }
  0xbf   :  { %v363_v27 = vpop.trf.xlu0 }
  0xc0   :  { %v378_v28 = vpack.c.bf16 %v363_v27, %v362_v20 }
  0xc3   :  { %v364_v33 = vpop.trf.xlu0 }
  0xc4   :  { %v379_v36 = vpack.c.bf16 %v364_v33, %v364_v33 }
 0x113   :  { %v919_v8 = vpop.f32.mrb[0].mxu0 }
 0x114   :  { %v146_v9 = vpop.f32.mrb[1].mxu0  ;;  %v162_v13 = vpack.c.bf16 %v919_v8, %v919_v8 }
 0x115   :  { %v920_v10 = vpop.f32.mrb[2].mxu0 }
 0x116   :  { %v149_v11 = vpop.f32.mrb[3].mxu0  ;;  %v169_v14 = vsel %vm167_vm2, %v162_v13, 0 }
 0x117   :  { %v161_v12 = vpack.c.bf16 %v149_v11, %v146_v9 }
 0x119   :  { %922 = vmatpush3.bf16.msra.mxu1 %v161_v12 }
 0x11a   :  { %923 = vmatprep.subr.bf16.mxu1 %v1148_v4 }
 0x11d   :  { %924 = vmatpush3.bf16.msra.mxu1 %v169_v14 }
 0x11e   :  { %937 = vmatprep.subr.bf16.mxu1 %v1148_v4 }
 0x120   :  { %926 = vmatmul.mubr.msk.bf16.vlgmr.msra.gmra.mrb[0].mxu1 %vm163_vm3, %v160_v7 }
 0x121   :  { %938 = vmatpush3.bf16.msra.mxu1 %v1016_v15  ;;  %941 = vmatprep.mubr.msk.bf16.mxu1 %vm1149_vm1, %v1148_v4 }
 0x122   :  { %939 = vmatprep.subr.bf16.mxu1 %v1148_v4 }
 0x125   :  { %940 = vmatpush3.bf16.msra.mxu1 %v1017_v16 }
 0x126   :  { %951 = vmatprep.subr.bf16.mxu1 %v1023_v39 }
 0x128   :  { %942 = vmatmul.mubr.msk.bf16.vlgmr.msra.gmra.mrb[4].mxu1 %vm105_vm0, %v1018_v17 }
 0x129   :  { %952 = vmatpush3.bf16.msra.mxu1 %v1023_v39 }
 0x12a   :  { %953 = vmatprep.subr.bf16.mxu1 %v1024_v40 }
 0x12d   :  { %954 = vmatpush3.bf16.msra.mxu1 %v1024_v40 }
 0x12e   :  { %967 = vmatprep.subr.bf16.mxu1 %v1148_v4 }
 0x1f3   :  { %v205_v21 = vpop.f32.mrb[0].mxu1 }
 0x1f4   :  { %v927_v22 = vpop.f32.mrb[1].mxu1  ;;  %v212_v24 = vmax.f32 %v205_v21, 0.0 }
 0x1f5   :  { %v208_v23 = vpop.f32.mrb[2].mxu1 }
 0x1f6   :  { %v213_v25 = vmax.f32 %v208_v23, 0.0  ;;  %v928_v26 = vpop.f32.mrb[3].mxu1 }
 0x1f8   :  { %v214_v29 = vpack.c.bf16 %v213_v25, %v212_v24 }
 0x1fa   :  { %934 = vmatmul.mubr.msk.bf16.vlgmr.msra.gmra.mrb[4].mxu0 %vm105_vm0, %v214_v29 }
 0x1fb   :  { %v339_v30 = vpop.f32.mrb[4].mxu1  ;;  %947 = vmatprep.mubr.msk.bf16.mxu0 %vm381_vm4, %v378_v28 }
 0x1fc   :  { %v943_v31 = vpop.f32.mrb[5].mxu1 }
 0x1fd   :  { %v342_v32 = vpop.f32.mrb[6].mxu1 }
 0x1fe   :  { %v380_v34 = vpack.c.bf16 %v342_v32, %v339_v30  ;;  %v944_v35 = vpop.f32.mrb[7].mxu1 }
 0x200   :  { %945 = vmatprep.subr.bf16.mxu0 %v380_v34 }
 0x201   :  { %946 = vmatpush3.bf16.msra.mxu0 %v380_v34 }
 0x202   :  { %959 = vmatprep.subr.bf16.mxu0 %v1148_v4 }
 0x204   :  { %948 = vmatmul.mubr.msk.bf16.vlgmr.msra.gmra.mrb[8].mxu0 %vm381_vm4, %v379_v36 }
 0x205   :  { %963 = vmatprep.mubr.msk.bf16.mxu0 %vm1149_vm1, %v1148_v4  ;;  %960 = vmatpush3.bf16.msra.mxu0 %v1021_v37 }
 0x206   :  { %961 = vmatprep.subr.bf16.mxu0 %v1148_v4 }
 0x209   :  { %962 = vmatpush3.bf16.msra.mxu0 %v1022_v38 }
 0x20a   :  { %975 = vmatprep.subr.bf16.mxu0 %v1148_v4 }
 0x2cd   :  { %v268_v41 = vpop.f32.mrb[4].mxu0 }
 0x2ce   :  { %v275_v42 = vmax.f32 %v268_v41, 0.0  ;;  %v935_v43 = vpop.f32.mrb[5].mxu0 }
 0x2cf   :  { %v271_v44 = vpop.f32.mrb[6].mxu0 }
 0x2d0   :  { %277 = vst.msk [vmem:[#allocation8] sm:$0xff] %vm105_vm0, %v275_v42  ;;  %v276_v45 = vmax.f32 %v271_v44, 0.0  ;;  %v936_v46 = vpop.f32.mrb[7].mxu0 }
 0x2d2   :  { %278 = vst.msk [vmem:[#allocation8 + $0x8] sm:$0xff] %vm105_vm0, %v276_v45  ;;  %v517_v47 = vpack.c.bf16 %v276_v45, %v275_v42 }
 0x2d4   :  { %964 = vmatmul.mubr.msk.bf16.vlgmr.msra.gmra.mrb[12].mxu0 %vm105_vm0, %v517_v47 }
 0x2d5   :  { %979 = vmatprep.mubr.msk.bf16.mxu0 %vm1149_vm1, %v1148_v4 }
 0x2d7   :  { %v949_v48 = vpop.f32.mrb[8].mxu0 }
 0x2d8   :  { %v438_v49 = vmax.f32 %v949_v48, 0.0  ;;  %v422_v50 = vpop.f32.mrb[9].mxu0 }
 0x2d9   :  { %v436_v51 = vmax.f32 %v422_v50, 0.0  ;;  %v950_v52 = vpop.f32.mrb[10].mxu0 }
 0x2da   :  { %v425_v53 = vpop.f32.mrb[11].mxu0  ;;  %v440_v55 = vpack.c.bf16 %v438_v49, %v438_v49 }
 0x2db   :  { %v437_v54 = vmax.f32 %v425_v53, 0.0 }
 0x2dd   :  { %v439_v56 = vpack.c.bf16 %v437_v54, %v436_v51 }
 0x2df   :  { %955 = vmatprep.mubr.msk.bf16.mxu1 %vm105_vm0, %v439_v56 }
 0x2e0   :  { %956 = vmatmul.mubr.msk.bf16.vlgmr.msra.gmra.mrb[8].mxu1 %vm105_vm0, %v440_v55 }
 0x2e1   :  { %971 = vmatprep.mubr.msk.bf16.mxu1 %vm1149_vm1, %v1148_v4 }
 0x3a7   :  { %v571_v57 = vpop.f32.mrb[12].mxu0 }
 0x3a8   :  { %v965_v58 = vpop.f32.mrb[13].mxu0 }
 0x3a9   :  { %v574_v59 = vpop.f32.mrb[14].mxu0 }
 0x3aa   :  { %v612_v60 = vpack.c.bf16 %v574_v59, %v571_v57  ;;  %v966_v61 = vpop.f32.mrb[15].mxu0 }
 0x3ac   :  { %758 = vrot.lane.b32.xlu0 %v612_v60, %s1150_s1  ;;  %660 = vrot.lane.b32.xlu1 %v612_v60, %s1151_s4 }
 0x3b0   :  { %709 = vrot.lane.b32.xlu1 %v612_v60, %s1145_s25  ;;  %s1152_s25 = smov [#allocation8]  }
 0x3b1   :  { %s812_s24 = sshll.u32 %s1152_s25, 4  ;;  %s813_s24 = int_to_ptr.vmem [resolvable:$true] %s812_s24 }
 0x3b2   :  { %s1091_s29 = scalar_lea.vmem %s813_s24, 256  ;;  %p1096_p11 = scmp.lt.s32.totalorder %s813_s24, %s813_s24 }
 0x3b3   :  { %v957_v62 = vpop.f32.mrb[8].mxu1  ;;  %p1092_p10 = scmp.ne.s32.totalorder %s813_s24, %s1091_s29  ;;  %p1097_p12 = scmp.lt.s32.totalorder %s1091_s29, %s1091_s29 }
 0x3b4   :  { %v513_v63 = vmax.f32 %v957_v62, 0.0  ;;  %v497_v0 = vpop.f32.mrb[9].mxu1 }
 0x3b5   :  { %v511_v1 = vmax.f32 %v497_v0, 0.0  ;;  %v958_v2 = vpop.f32.mrb[10].mxu1  ;;  %p1098_p13 = por %p1097_p12, %p1096_p11 }
 0x3b6   :  { %516 = vst.msk [vmem:[#allocation9 + $0x10] sm:$0xff] %vm105_vm0, %v513_v63  ;;  %v500_v3 = vpop.f32.mrb[11].mxu1 }
 0x3b7   :  { %514 = vst.msk [vmem:[#allocation9] sm:$0xff] %vm105_vm0, %v511_v1  ;;  %v512_v5 = vmax.f32 %v500_v3, 0.0  ;;  %p1099_p0 = pnand %p1098_p13, %p1092_p10 }
 0x3b9   :  { %515 = vst.msk [vmem:[#allocation9 + $0x8] sm:$0xff] %vm105_vm0, %v512_v5 }
 0x3d9   :  { %578 = vxpose.xlu1.b32.start [1/3] (short) (narrow) %v511_v1, 32 }
 0x3dd   :  { %579 = vxpose.xlu1.b32.cont [2/3] (short) (narrow) %v512_v5, 32 }
 0x3e1   :  { %580 = vxpose.xlu1.b32.end [3/3] (short) (narrow) %v513_v63, 32 }
 0x41e   :  { %v661_v6 = vpop.permute.xlu1 %660  ;;  %v759_v14 = vpop.permute.xlu0 %758 }
 0x422   :  { %v710_v7 = vpop.permute.xlu1 %709 }
 0x459   :  { %v594_v8 = vpop.trf.xlu1 }
 0x45d   :  { %v595_v9 = vpop.trf.xlu1 }
 0x45e   :  { %v610_v10 = vpack.c.bf16 %v595_v9, %v594_v8 }
 0x460   :  { %968 = vmatpush3.bf16.msra.mxu1 %v610_v10  ;;  %976 = vmatpush3.bf16.msra.mxu0 %v610_v10 }
 0x461   :  { %v596_v11 = vpop.trf.xlu1  ;;  %969 = vmatprep.subr.bf16.mxu1 %v1148_v4  ;;  %977 = vmatprep.subr.bf16.mxu0 %v1148_v4 }
 0x465   :  { %v597_v12 = vpop.trf.xlu1 }
 0x466   :  { %v611_v13 = vpack.c.bf16 %v597_v12, %v596_v11 }
 0x468   :  { %970 = vmatpush3.bf16.msra.mxu1 %v611_v13  ;;  %978 = vmatpush3.bf16.msra.mxu0 %v611_v13 }
 0x469   :  { %983 = vmatprep.subr.bf16.mxu1 %v1148_v4  ;;  %991 = vmatprep.subr.bf16.mxu0 %v1148_v4 }
 0x46b   :  { %972 = vmatmul.mubr.msk.bf16.vlgmr.msra.gmra.mrb[12].mxu1 %vm105_vm0, %v612_v60  ;;  %980 = vmatmul.mubr.msk.bf16.vlgmr.msra.gmra.mrb[16].mxu0 %vm105_vm0, %v661_v6 }
 0x46c   :  { %984 = vmatpush3.bf16.msra.mxu1 %v610_v10  ;;  %992 = vmatpush3.bf16.msra.mxu0 %v610_v10 }
 0x46d   :  { %985 = vmatprep.subr.bf16.mxu1 %v1148_v4  ;;  %993 = vmatprep.subr.bf16.mxu0 %v1148_v4 }
 0x46e   :  { %987 = vmatprep.mubr.msk.bf16.mxu1 %vm1149_vm1, %v1148_v4  ;;  %995 = vmatprep.mubr.msk.bf16.mxu0 %vm1149_vm1, %v1148_v4 }
 0x470   :  { %986 = vmatpush3.bf16.msra.mxu1 %v611_v13  ;;  %994 = vmatpush3.bf16.msra.mxu0 %v611_v13 }
 0x473   :  { %988 = vmatmul.mubr.msk.bf16.vlgmr.msra.gmra.mrb[16].mxu1 %vm105_vm0, %v710_v7  ;;  %996 = vmatmul.mubr.msk.bf16.vlgmr.msra.gmra.mrb[20].mxu0 %vm105_vm0, %v759_v14 }
 0x474   :  { %1102 = shalt.err (!%p1099_p0)
}
 0x475   :  { %s1103_s16 = scalar_lea.hbm %s1411_s8, 256 }
 0x476   :  { %p1104_p1 = scmp.ne.s32.totalorder %s1411_s8, %s1103_s16  ;;  %p1107_p2 = scmp.lt.u32.totalorder %s1103_s16, %s1411_s8 }
 0x478   :  { %p1109_p3 = pnand %p1107_p2, %p1104_p1 }
 0x47a   :  { %1112 = shalt.err (!%p1109_p3)
}
 0x47b   :  { %s1154_s17 = smov 128   ;;  %s1155_s18 = smov 8  }
 0x47c   :  { %818 = dma.vmem_to_hbm [thread:$0]  %s813_s24, 256, %s1411_s8, [#allocation4], %s1154_s17, %s1154_s17, %s1155_s18  }
 0x47d   :  { %s1113_s3 = scalar_lea.vmem %s1340_s28, 384  ;;  %p1118_p5 = scmp.lt.s32.totalorder %s1340_s28, %s1340_s28 }
 0x47e   :  { %p1114_p4 = scmp.ne.s32.totalorder %s1340_s28, %s1113_s3  ;;  %p1119_p6 = scmp.lt.s32.totalorder %s1113_s3, %s1113_s3 }
 0x480   :  { %p1120_p7 = por %p1119_p6, %p1118_p5 }
 0x482   :  { %p1121_p8 = pnand %p1120_p7, %p1114_p4 }
 0x484   :  { %1124 = shalt.err (!%p1121_p8)
}
 0x485   :  { %s1125_s19 = scalar_lea.hbm %s1412_s9, 384 }
 0x486   :  { %p1126_p9 = scmp.ne.s32.totalorder %s1412_s9, %s1125_s19  ;;  %p1129_p10 = scmp.lt.u32.totalorder %s1125_s19, %s1412_s9 }
 0x488   :  { %p1131_p11 = pnand %p1129_p10, %p1126_p9 }
 0x48a   :  { %1134 = shalt.err (!%p1131_p11)
}
 0x48b   :  { %830 = dma.vmem_to_hbm [thread:$0]  %s1340_s28, 384, %s1412_s9, [#allocation10], %s1154_s17, %s1154_s17, %s1155_s18  }
 0x53e   :  { %v650_v4 = vpop.f32.mrb[12].mxu1  ;;  %v699_v15 = vpop.f32.mrb[16].mxu0 }
 0x53f   :  { %657 = vst.msk [vmem:[%s1413_s10] sm:$0xff] %vm163_vm3, %v650_v4  ;;  %870 = vst.msk [vmem:[%s1413_s10 + $0x10] sm:$0xff] %vm163_vm3, %v699_v15  ;;  %v973_v16 = vpop.f32.mrb[13].mxu1  ;;  %v981_v17 = vpop.f32.mrb[17].mxu0 }
 0x540   :  { %v653_v18 = vpop.f32.mrb[14].mxu1  ;;  %v702_v19 = vpop.f32.mrb[18].mxu0 }
 0x541   :  { %658 = vst.msk [vmem:[%s1413_s10 + $0x8] sm:$0xff] %vm163_vm3, %v653_v18  ;;  %871 = vst.msk [vmem:[%s1413_s10 + $0x18] sm:$0xff] %vm163_vm3, %v702_v19  ;;  %v974_v20 = vpop.f32.mrb[15].mxu1  ;;  %v982_v21 = vpop.f32.mrb[19].mxu0 }
 0x546   :  { %v748_v22 = vpop.f32.mrb[16].mxu1  ;;  %v797_v23 = vpop.f32.mrb[20].mxu0 }
 0x547   :  { %873 = vst.msk [vmem:[%s1413_s10 + $0x20] sm:$0xff] %vm163_vm3, %v748_v22  ;;  %876 = vst.msk [vmem:[%s1413_s10 + $0x30] sm:$0xff] %vm163_vm3, %v797_v23  ;;  %v989_v24 = vpop.f32.mrb[17].mxu1  ;;  %v997_v25 = vpop.f32.mrb[21].mxu0 }
 0x548   :  { %v751_v26 = vpop.f32.mrb[18].mxu1  ;;  %v800_v27 = vpop.f32.mrb[22].mxu0 }
 0x549   :  { %874 = vst.msk [vmem:[%s1413_s10 + $0x28] sm:$0xff] %vm163_vm3, %v751_v26  ;;  %877 = vst.msk [vmem:[%s1413_s10 + $0x38] sm:$0xff] %vm163_vm3, %v800_v27  ;;  %v990_v28 = vpop.f32.mrb[19].mxu1  ;;  %v998_v29 = vpop.f32.mrb[23].mxu0 }
 0x54a   :  { %1139 = dma.done.wait [#allocation4], 256  }
 0x54b   :  { %1140 = vsyncadd [#allocation4], 4294967040 }
 0x54c   :  { %1141 = dma.done.wait [#allocation10], 384  }
 0x54d   :  { %1142 = vsyncadd [#allocation10], 4294966912 }
 0x54e   :  { %841 = vsyncpa [#allocation3], 1 }
 0x54f   :  { %842 = vsyncpa [#allocation6], 1 }
 0x550   :  { %843 = vsyncpa [#allocation4], 1 }
 0x551   :  { %844 = vsyncpa [#allocation10], 1 }

</bundles_post_ra>
